<compile_context>
chip_gen: v6e
topology: v6e:2x2x1
jax: 0.10.0
libtpu: 0.0.40
codegen_flags: <defaults>
</compile_context>

<pallas_src>
import math

import jax
import jax.numpy as jnp
from jax.experimental import pallas as pl
from jax.experimental.pallas import tpu as pltpu

KH = KW = 3


def _upsample_conv_kernel(x_ref, w_ref, b_ref, o_ref):
    # x_ref : (1, 1, C, TH+2, W+2)  zero-padded ORIGINAL-resolution input tile (VMEM)
    # w_ref : (16, O, C)            phase/tap-combined 2x2 conv weights (VMEM)
    # b_ref : (O, 1)                bias (VMEM)
    # o_ref : (1, 1, 4, O, TH*W)    per-phase, lane-dense output tile (VMEM)
    C = x_ref.shape[2]
    TH = x_ref.shape[3] - 2
    W = x_ref.shape[4] - 2
    O = o_ref.shape[3]

    # 9 shifted views of the padded tile, flattened to lane-dense (C, TH*W) slabs.
    # (The offsets needed by the 4 phases x 4 taps are exactly {0,1,2}^2.)
    slabs = {}
    for a in range(3):
        for b in range(3):
            slabs[(a, b)] = x_ref[0, 0, :, a:a + TH, b:b + W].reshape(C, TH * W)

    bias = b_ref[...]  # (O, 1) broadcasts over the lane-dense spatial axis
    for py in range(2):
        for px in range(2):
            acc = None
            for kh in range(2):
                for kw in range(2):
                    t = ((py * 2 + px) * 2 + kh) * 2 + kw
                    contrib = jnp.dot(w_ref[t], slabs[(py + kh, px + kw)],
                                      preferred_element_type=jnp.float32)
                    acc = contrib if acc is None else acc + contrib
            o_ref[0, 0, py * 2 + px] = (acc + bias).astype(o_ref.dtype)


def _choose_row_tile(C, O, H, W, budget_bytes=16 << 20):
    """Largest row-tile TH (divisor of H) whose working set fits the budget,
    preferring >= 2 lane-dense tiles so the pipeline / second core get work."""
    divs = sorted((d for d in range(1, H + 1) if H % d == 0), reverse=True)

    def footprint(th):
        # double-buffered in/out blocks + the 9 in-kernel patch slabs (f32)
        return 4 * (2 * C * (th + 2) * (W + 2) + 2 * 4 * O * th * W + 9 * C * th * W)

    fitting = [d for d in divs if footprint(d) <= budget_bytes]
    if not fitting:
        return divs[-1]
    multi_tile = [d for d in fitting if d < H and (d * W) % 128 == 0]
    return multi_tile[0] if multi_tile else fitting[0]


def upsample_forward(x, weight, bias):
    """Equivalent of UpSample.forward: F.interpolate(x, 2, 'nearest') -> conv3x3(pad=1)."""
    N, C, H, W = x.shape
    O = weight.shape[0]
    TH = _choose_row_tile(C, O, H, W)
    n_t = H // TH

    # Fold nearest-2x into the conv: combine the 3x3 weights into 4 phase-specific
    # 2x2 taps.  V[p, k, d] maps original 3x3 row-tap d onto 2x2 row-tap k for
    # output-row parity p (same matrix is used for columns).
    V = jnp.array([[[1.0, 0.0, 0.0], [0.0, 1.0, 1.0]],
                   [[1.0, 1.0, 0.0], [0.0, 0.0, 1.0]]], dtype=jnp.float32)
    w32 = weight.astype(jnp.float32)
    wq = jnp.einsum('pkd,qle,ocde->pqkloc', V, V, w32).reshape(16, O, C)

    # Zero-pad the ORIGINAL image (cheap) and cut overlapping row tiles (2-row halo).
    xp = jnp.pad(x.astype(jnp.float32), ((0, 0), (0, 0), (1, 1), (1, 1)))
    if n_t == 1:
        xt = xp[:, None]
    else:
        xt = jnp.stack([xp[:, :, t * TH:t * TH + TH + 2, :] for t in range(n_t)],
                       axis=1)
    # xt: (N, n_t, C, TH+2, W+2)

    out = pl.pallas_call(
        _upsample_conv_kernel,
        out_shape=jax.ShapeDtypeStruct((N, n_t, 4, O, TH * W), jnp.float32),
        grid=(N, n_t),
        in_specs=[
            pl.BlockSpec((1, 1, C, TH + 2, W + 2), lambda n, t: (n, t, 0, 0, 0)),
            pl.BlockSpec((16, O, C), lambda n, t: (0, 0, 0)),
            pl.BlockSpec((O, 1), lambda n, t: (0, 0)),
        ],
        out_specs=pl.BlockSpec((1, 1, 4, O, TH * W), lambda n, t: (n, t, 0, 0, 0)),
        compiler_params=pltpu.CompilerParams(
            dimension_semantics=("parallel", "parallel"),
            vmem_limit_bytes=48 * 1024 * 1024,
        ),
    )(xt, wq, bias.astype(jnp.float32)[:, None])

    # De-interleave the 4 phase planes back to NCHW at 2x resolution.
    # TODO(synk): this final transpose is layout glue left to XLA; it could be fused
    # into the kernel by interleaving phases in VMEM before the store.
    y = out.reshape(N, n_t, 2, 2, O, TH, W)
    y = y.transpose(0, 4, 1, 5, 2, 6, 3)  # (N, O, n_t, TH, py, W, px)
    return y.reshape(N, O, 2 * H, 2 * W)


if __name__ == "__main__":
    key = jax.random.PRNGKey(0)
    kx, kw = jax.random.split(key)

    N, in_ch, H, W = 2, 4, 16, 16

    # Deterministic params mirroring UpSample.initialize():
    #   xavier_uniform_ on the conv weight, zeros on the bias.
    fan_in = in_ch * KH * KW
    fan_out = in_ch * KH * KW
    bound = math.sqrt(6.0 / (fan_in + fan_out))
    weight = jax.random.uniform(kw, (in_ch, in_ch, KH, KW), jnp.float32, -bound, bound)
    bias = jnp.zeros((in_ch,), jnp.float32)

    x = jax.random.normal(kx, (N, in_ch, H, W), jnp.float32)

    out = upsample_forward(x, weight, bias)
    out = jax.block_until_ready(out)

    # Pure-JAX reference (nearest 2x upsample + 3x3 conv, pad 1).
    x_up = jnp.repeat(jnp.repeat(x, 2, axis=2), 2, axis=3)
    ref = jax.lax.conv_general_dilated(
        x_up, weight, window_strides=(1, 1), padding=((1, 1), (1, 1)),
        dimension_numbers=("NCHW", "OIHW", "NCHW"),
    ) + bias[None, :, None, None]

    assert out.shape == (N, in_ch, 2 * H, 2 * W), out.shape
    err = float(jnp.max(jnp.abs(out - ref)))
    assert jnp.allclose(out, ref, atol=1e-4, rtol=1e-4), err
    print("KERNEL_OK")
</pallas_src>

<mosaic_0001>
module attributes {stable_mosaic.version = 11 : i64} {
  func.func @_upsample_conv_kernel(%arg0: i32, %arg1: i32, %arg2: memref<1x1x4x10x18xf32, #tpu.memory_space<vmem>>, %arg3: memref<16x4x4xf32, #tpu.memory_space<vmem>>, %arg4: memref<4x1xf32, #tpu.memory_space<vmem>>, %arg5: memref<1x1x4x4x128xf32, #tpu.memory_space<vmem>>) attributes {dimension_semantics = [#tpu.dimension_semantics<parallel>, #tpu.dimension_semantics<parallel>], iteration_bounds = array<i64: 2, 2>, scalar_prefetch = 0 : i64, scratch_operands = 0 : i64, tpu.core_type = #tpu.core_type<tc>, window_params = [{transform_indices = @transform_0, window_bounds = array<i64: 1, 1, 4, 10, 18>}, {pipeline_mode = #tpu.pipeline_mode<synchronous>, transform_indices = @transform_1, window_bounds = array<i64: 16, 4, 4>}, {pipeline_mode = #tpu.pipeline_mode<synchronous>, transform_indices = @transform_2, window_bounds = array<i64: 4, 1>}, {transform_indices = @transform_3, window_bounds = array<i64: 1, 1, 4, 4, 128>}]} {
    %c0 = arith.constant 0 : index
    %c0_0 = arith.constant 0 : index
    %c0_1 = arith.constant 0 : index
    %c0_2 = arith.constant 0 : index
    %c0_3 = arith.constant 0 : index
    %0 = vector.load %arg2[%c0, %c0_0, %c0_1, %c0_2, %c0_3] : memref<1x1x4x10x18xf32, #tpu.memory_space<vmem>>, vector<1x1x4x8x16xf32>
    %1 = vector.shape_cast %0 : vector<1x1x4x8x16xf32> to vector<4x8x16xf32>
    %2 = vector.shape_cast %1 : vector<4x8x16xf32> to vector<4x128xf32>
    %c0_4 = arith.constant 0 : index
    %c0_5 = arith.constant 0 : index
    %c0_6 = arith.constant 0 : index
    %c0_7 = arith.constant 0 : index
    %c1 = arith.constant 1 : index
    %3 = vector.load %arg2[%c0_4, %c0_5, %c0_6, %c0_7, %c1] : memref<1x1x4x10x18xf32, #tpu.memory_space<vmem>>, vector<1x1x4x8x16xf32>
    %4 = vector.shape_cast %3 : vector<1x1x4x8x16xf32> to vector<4x8x16xf32>
    %5 = vector.shape_cast %4 : vector<4x8x16xf32> to vector<4x128xf32>
    %c0_8 = arith.constant 0 : index
    %c0_9 = arith.constant 0 : index
    %c0_10 = arith.constant 0 : index
    %c0_11 = arith.constant 0 : index
    %c2 = arith.constant 2 : index
    %6 = vector.load %arg2[%c0_8, %c0_9, %c0_10, %c0_11, %c2] : memref<1x1x4x10x18xf32, #tpu.memory_space<vmem>>, vector<1x1x4x8x16xf32>
    %7 = vector.shape_cast %6 : vector<1x1x4x8x16xf32> to vector<4x8x16xf32>
    %8 = vector.shape_cast %7 : vector<4x8x16xf32> to vector<4x128xf32>
    %c0_12 = arith.constant 0 : index
    %c0_13 = arith.constant 0 : index
    %c0_14 = arith.constant 0 : index
    %c1_15 = arith.constant 1 : index
    %c0_16 = arith.constant 0 : index
    %9 = vector.load %arg2[%c0_12, %c0_13, %c0_14, %c1_15, %c0_16] : memref<1x1x4x10x18xf32, #tpu.memory_space<vmem>>, vector<1x1x4x8x16xf32>
    %10 = vector.shape_cast %9 : vector<1x1x4x8x16xf32> to vector<4x8x16xf32>
    %11 = vector.shape_cast %10 : vector<4x8x16xf32> to vector<4x128xf32>
    %c0_17 = arith.constant 0 : index
    %c0_18 = arith.constant 0 : index
    %c0_19 = arith.constant 0 : index
    %c1_20 = arith.constant 1 : index
    %c1_21 = arith.constant 1 : index
    %12 = vector.load %arg2[%c0_17, %c0_18, %c0_19, %c1_20, %c1_21] : memref<1x1x4x10x18xf32, #tpu.memory_space<vmem>>, vector<1x1x4x8x16xf32>
    %13 = vector.shape_cast %12 : vector<1x1x4x8x16xf32> to vector<4x8x16xf32>
    %14 = vector.shape_cast %13 : vector<4x8x16xf32> to vector<4x128xf32>
    %c0_22 = arith.constant 0 : index
    %c0_23 = arith.constant 0 : index
    %c0_24 = arith.constant 0 : index
    %c1_25 = arith.constant 1 : index
    %c2_26 = arith.constant 2 : index
    %15 = vector.load %arg2[%c0_22, %c0_23, %c0_24, %c1_25, %c2_26] : memref<1x1x4x10x18xf32, #tpu.memory_space<vmem>>, vector<1x1x4x8x16xf32>
    %16 = vector.shape_cast %15 : vector<1x1x4x8x16xf32> to vector<4x8x16xf32>
    %17 = vector.shape_cast %16 : vector<4x8x16xf32> to vector<4x128xf32>
    %c0_27 = arith.constant 0 : index
    %c0_28 = arith.constant 0 : index
    %c0_29 = arith.constant 0 : index
    %c2_30 = arith.constant 2 : index
    %c0_31 = arith.constant 0 : index
    %18 = vector.load %arg2[%c0_27, %c0_28, %c0_29, %c2_30, %c0_31] : memref<1x1x4x10x18xf32, #tpu.memory_space<vmem>>, vector<1x1x4x8x16xf32>
    %19 = vector.shape_cast %18 : vector<1x1x4x8x16xf32> to vector<4x8x16xf32>
    %20 = vector.shape_cast %19 : vector<4x8x16xf32> to vector<4x128xf32>
    %c0_32 = arith.constant 0 : index
    %c0_33 = arith.constant 0 : index
    %c0_34 = arith.constant 0 : index
    %c2_35 = arith.constant 2 : index
    %c1_36 = arith.constant 1 : index
    %21 = vector.load %arg2[%c0_32, %c0_33, %c0_34, %c2_35, %c1_36] : memref<1x1x4x10x18xf32, #tpu.memory_space<vmem>>, vector<1x1x4x8x16xf32>
    %22 = vector.shape_cast %21 : vector<1x1x4x8x16xf32> to vector<4x8x16xf32>
    %23 = vector.shape_cast %22 : vector<4x8x16xf32> to vector<4x128xf32>
    %c0_37 = arith.constant 0 : index
    %c0_38 = arith.constant 0 : index
    %c0_39 = arith.constant 0 : index
    %c2_40 = arith.constant 2 : index
    %c2_41 = arith.constant 2 : index
    %24 = vector.load %arg2[%c0_37, %c0_38, %c0_39, %c2_40, %c2_41] : memref<1x1x4x10x18xf32, #tpu.memory_space<vmem>>, vector<1x1x4x8x16xf32>
    %25 = vector.shape_cast %24 : vector<1x1x4x8x16xf32> to vector<4x8x16xf32>
    %26 = vector.shape_cast %25 : vector<4x8x16xf32> to vector<4x128xf32>
    %c0_42 = arith.constant 0 : index
    %c0_43 = arith.constant 0 : index
    %27 = vector.load %arg4[%c0_42, %c0_43] : memref<4x1xf32, #tpu.memory_space<vmem>>, vector<4x1xf32>
    %c0_44 = arith.constant 0 : index
    %c0_45 = arith.constant 0 : index
    %c0_46 = arith.constant 0 : index
    %28 = vector.load %arg3[%c0_44, %c0_45, %c0_46] : memref<16x4x4xf32, #tpu.memory_space<vmem>>, vector<1x4x4xf32>
    %29 = vector.shape_cast %28 : vector<1x4x4xf32> to vector<4x4xf32>
    %cst = arith.constant dense<0.000000e+00> : vector<4x128xf32>
    %30 = tpu.matmul %29, %2, %cst {dimension_numbers = #tpu.dot_dimension_numbers<[1], [0], [0], [1], [0, 0, 1, 1], [], []>} : vector<4x4xf32>, vector<4x128xf32>, vector<4x128xf32> -> vector<4x128xf32>
    %c1_47 = arith.constant 1 : index
    %c0_48 = arith.constant 0 : index
    %c0_49 = arith.constant 0 : index
    %31 = vector.load %arg3[%c1_47, %c0_48, %c0_49] : memref<16x4x4xf32, #tpu.memory_space<vmem>>, vector<1x4x4xf32>
    %32 = vector.shape_cast %31 : vector<1x4x4xf32> to vector<4x4xf32>
    %cst_50 = arith.constant dense<0.000000e+00> : vector<4x128xf32>
    %33 = tpu.matmul %32, %5, %cst_50 {dimension_numbers = #tpu.dot_dimension_numbers<[1], [0], [0], [1], [0, 0, 1, 1], [], []>} : vector<4x4xf32>, vector<4x128xf32>, vector<4x128xf32> -> vector<4x128xf32>
    %34 = arith.addf %30, %33 : vector<4x128xf32>
    %c2_51 = arith.constant 2 : index
    %c0_52 = arith.constant 0 : index
    %c0_53 = arith.constant 0 : index
    %35 = vector.load %arg3[%c2_51, %c0_52, %c0_53] : memref<16x4x4xf32, #tpu.memory_space<vmem>>, vector<1x4x4xf32>
    %36 = vector.shape_cast %35 : vector<1x4x4xf32> to vector<4x4xf32>
    %cst_54 = arith.constant dense<0.000000e+00> : vector<4x128xf32>
    %37 = tpu.matmul %36, %11, %cst_54 {dimension_numbers = #tpu.dot_dimension_numbers<[1], [0], [0], [1], [0, 0, 1, 1], [], []>} : vector<4x4xf32>, vector<4x128xf32>, vector<4x128xf32> -> vector<4x128xf32>
    %38 = arith.addf %34, %37 : vector<4x128xf32>
    %c3 = arith.constant 3 : index
    %c0_55 = arith.constant 0 : index
    %c0_56 = arith.constant 0 : index
    %39 = vector.load %arg3[%c3, %c0_55, %c0_56] : memref<16x4x4xf32, #tpu.memory_space<vmem>>, vector<1x4x4xf32>
    %40 = vector.shape_cast %39 : vector<1x4x4xf32> to vector<4x4xf32>
    %cst_57 = arith.constant dense<0.000000e+00> : vector<4x128xf32>
    %41 = tpu.matmul %40, %14, %cst_57 {dimension_numbers = #tpu.dot_dimension_numbers<[1], [0], [0], [1], [0, 0, 1, 1], [], []>} : vector<4x4xf32>, vector<4x128xf32>, vector<4x128xf32> -> vector<4x128xf32>
    %42 = arith.addf %38, %41 : vector<4x128xf32>
    %43 = vector.broadcast %27 : vector<4x1xf32> to vector<4x128xf32>
    %44 = arith.addf %42, %43 : vector<4x128xf32>
    %c0_58 = arith.constant 0 : index
    %c0_59 = arith.constant 0 : index
    %c0_60 = arith.constant 0 : index
    %c0_61 = arith.constant 0 : index
    %c0_62 = arith.constant 0 : index
    %45 = vector.load %arg5[%c0_58, %c0_59, %c0_60, %c0_61, %c0_62] : memref<1x1x4x4x128xf32, #tpu.memory_space<vmem>>, vector<1x1x1x4x128xf32>
    %46 = vector.shape_cast %45 : vector<1x1x1x4x128xf32> to vector<4x128xf32>
    %47 = vector.shape_cast %44 : vector<4x128xf32> to vector<1x1x1x4x128xf32>
    tpu.vector_store %arg5[%c0_58, %c0_59, %c0_60, %c0_61, %c0_62], %47 {strides = array<i32>} : memref<1x1x4x4x128xf32, #tpu.memory_space<vmem>>, vector<1x1x1x4x128xf32>,
    %c4 = arith.constant 4 : index
    %c0_63 = arith.constant 0 : index
    %c0_64 = arith.constant 0 : index
    %48 = vector.load %arg3[%c4, %c0_63, %c0_64] : memref<16x4x4xf32, #tpu.memory_space<vmem>>, vector<1x4x4xf32>
    %49 = vector.shape_cast %48 : vector<1x4x4xf32> to vector<4x4xf32>
    %cst_65 = arith.constant dense<0.000000e+00> : vector<4x128xf32>
    %50 = tpu.matmul %49, %5, %cst_65 {dimension_numbers = #tpu.dot_dimension_numbers<[1], [0], [0], [1], [0, 0, 1, 1], [], []>} : vector<4x4xf32>, vector<4x128xf32>, vector<4x128xf32> -> vector<4x128xf32>
    %c5 = arith.constant 5 : index
    %c0_66 = arith.constant 0 : index
    %c0_67 = arith.constant 0 : index
    %51 = vector.load %arg3[%c5, %c0_66, %c0_67] : memref<16x4x4xf32, #tpu.memory_space<vmem>>, vector<1x4x4xf32>
    %52 = vector.shape_cast %51 : vector<1x4x4xf32> to vector<4x4xf32>
    %cst_68 = arith.constant dense<0.000000e+00> : vector<4x128xf32>
    %53 = tpu.matmul %52, %8, %cst_68 {dimension_numbers = #tpu.dot_dimension_numbers<[1], [0], [0], [1], [0, 0, 1, 1], [], []>} : vector<4x4xf32>, vector<4x128xf32>, vector<4x128xf32> -> vector<4x128xf32>
    %54 = arith.addf %50, %53 : vector<4x128xf32>
    %c6 = arith.constant 6 : index
    %c0_69 = arith.constant 0 : index
    %c0_70 = arith.constant 0 : index
    %55 = vector.load %arg3[%c6, %c0_69, %c0_70] : memref<16x4x4xf32, #tpu.memory_space<vmem>>, vector<1x4x4xf32>
    %56 = vector.shape_cast %55 : vector<1x4x4xf32> to vector<4x4xf32>
    %cst_71 = arith.constant dense<0.000000e+00> : vector<4x128xf32>
    %57 = tpu.matmul %56, %14, %cst_71 {dimension_numbers = #tpu.dot_dimension_numbers<[1], [0], [0], [1], [0, 0, 1, 1], [], []>} : vector<4x4xf32>, vector<4x128xf32>, vector<4x128xf32> -> vector<4x128xf32>
    %58 = arith.addf %54, %57 : vector<4x128xf32>
    %c7 = arith.constant 7 : index
    %c0_72 = arith.constant 0 : index
    %c0_73 = arith.constant 0 : index
    %59 = vector.load %arg3[%c7, %c0_72, %c0_73] : memref<16x4x4xf32, #tpu.memory_space<vmem>>, vector<1x4x4xf32>
    %60 = vector.shape_cast %59 : vector<1x4x4xf32> to vector<4x4xf32>
    %cst_74 = arith.constant dense<0.000000e+00> : vector<4x128xf32>
    %61 = tpu.matmul %60, %17, %cst_74 {dimension_numbers = #tpu.dot_dimension_numbers<[1], [0], [0], [1], [0, 0, 1, 1], [], []>} : vector<4x4xf32>, vector<4x128xf32>, vector<4x128xf32> -> vector<4x128xf32>
    %62 = arith.addf %58, %61 : vector<4x128xf32>
    %63 = vector.broadcast %27 : vector<4x1xf32> to vector<4x128xf32>
    %64 = arith.addf %62, %63 : vector<4x128xf32>
    %c0_75 = arith.constant 0 : index
    %c0_76 = arith.constant 0 : index
    %c1_77 = arith.constant 1 : index
    %c0_78 = arith.constant 0 : index
    %c0_79 = arith.constant 0 : index
    %65 = vector.load %arg5[%c0_75, %c0_76, %c1_77, %c0_78, %c0_79] : memref<1x1x4x4x128xf32, #tpu.memory_space<vmem>>, vector<1x1x1x4x128xf32>
    %66 = vector.shape_cast %65 : vector<1x1x1x4x128xf32> to vector<4x128xf32>
    %67 = vector.shape_cast %64 : vector<4x128xf32> to vector<1x1x1x4x128xf32>
    tpu.vector_store %arg5[%c0_75, %c0_76, %c1_77, %c0_78, %c0_79], %67 {strides = array<i32>} : memref<1x1x4x4x128xf32, #tpu.memory_space<vmem>>, vector<1x1x1x4x128xf32>,
    %c8 = arith.constant 8 : index
    %c0_80 = arith.constant 0 : index
    %c0_81 = arith.constant 0 : index
    %68 = vector.load %arg3[%c8, %c0_80, %c0_81] : memref<16x4x4xf32, #tpu.memory_space<vmem>>, vector<1x4x4xf32>
    %69 = vector.shape_cast %68 : vector<1x4x4xf32> to vector<4x4xf32>
    %cst_82 = arith.constant dense<0.000000e+00> : vector<4x128xf32>
    %70 = tpu.matmul %69, %11, %cst_82 {dimension_numbers = #tpu.dot_dimension_numbers<[1], [0], [0], [1], [0, 0, 1, 1], [], []>} : vector<4x4xf32>, vector<4x128xf32>, vector<4x128xf32> -> vector<4x128xf32>
    %c9 = arith.constant 9 : index
    %c0_83 = arith.constant 0 : index
    %c0_84 = arith.constant 0 : index
    %71 = vector.load %arg3[%c9, %c0_83, %c0_84] : memref<16x4x4xf32, #tpu.memory_space<vmem>>, vector<1x4x4xf32>
    %72 = vector.shape_cast %71 : vector<1x4x4xf32> to vector<4x4xf32>
    %cst_85 = arith.constant dense<0.000000e+00> : vector<4x128xf32>
    %73 = tpu.matmul %72, %14, %cst_85 {dimension_numbers = #tpu.dot_dimension_numbers<[1], [0], [0], [1], [0, 0, 1, 1], [], []>} : vector<4x4xf32>, vector<4x128xf32>, vector<4x128xf32> -> vector<4x128xf32>
    %74 = arith.addf %70, %73 : vector<4x128xf32>
    %c10 = arith.constant 10 : index
    %c0_86 = arith.constant 0 : index
    %c0_87 = arith.constant 0 : index
    %75 = vector.load %arg3[%c10, %c0_86, %c0_87] : memref<16x4x4xf32, #tpu.memory_space<vmem>>, vector<1x4x4xf32>
    %76 = vector.shape_cast %75 : vector<1x4x4xf32> to vector<4x4xf32>
    %cst_88 = arith.constant dense<0.000000e+00> : vector<4x128xf32>
    %77 = tpu.matmul %76, %20, %cst_88 {dimension_numbers = #tpu.dot_dimension_numbers<[1], [0], [0], [1], [0, 0, 1, 1], [], []>} : vector<4x4xf32>, vector<4x128xf32>, vector<4x128xf32> -> vector<4x128xf32>
    %78 = arith.addf %74, %77 : vector<4x128xf32>
    %c11 = arith.constant 11 : index
    %c0_89 = arith.constant 0 : index
    %c0_90 = arith.constant 0 : index
    %79 = vector.load %arg3[%c11, %c0_89, %c0_90] : memref<16x4x4xf32, #tpu.memory_space<vmem>>, vector<1x4x4xf32>
    %80 = vector.shape_cast %79 : vector<1x4x4xf32> to vector<4x4xf32>
    %cst_91 = arith.constant dense<0.000000e+00> : vector<4x128xf32>
    %81 = tpu.matmul %80, %23, %cst_91 {dimension_numbers = #tpu.dot_dimension_numbers<[1], [0], [0], [1], [0, 0, 1, 1], [], []>} : vector<4x4xf32>, vector<4x128xf32>, vector<4x128xf32> -> vector<4x128xf32>
    %82 = arith.addf %78, %81 : vector<4x128xf32>
    %83 = vector.broadcast %27 : vector<4x1xf32> to vector<4x128xf32>
    %84 = arith.addf %82, %83 : vector<4x128xf32>
    %c0_92 = arith.constant 0 : index
    %c0_93 = arith.constant 0 : index
    %c2_94 = arith.constant 2 : index
    %c0_95 = arith.constant 0 : index
    %c0_96 = arith.constant 0 : index
    %85 = vector.load %arg5[%c0_92, %c0_93, %c2_94, %c0_95, %c0_96] : memref<1x1x4x4x128xf32, #tpu.memory_space<vmem>>, vector<1x1x1x4x128xf32>
    %86 = vector.shape_cast %85 : vector<1x1x1x4x128xf32> to vector<4x128xf32>
    %87 = vector.shape_cast %84 : vector<4x128xf32> to vector<1x1x1x4x128xf32>
    tpu.vector_store %arg5[%c0_92, %c0_93, %c2_94, %c0_95, %c0_96], %87 {strides = array<i32>} : memref<1x1x4x4x128xf32, #tpu.memory_space<vmem>>, vector<1x1x1x4x128xf32>,
    %c12 = arith.constant 12 : index
    %c0_97 = arith.constant 0 : index
    %c0_98 = arith.constant 0 : index
    %88 = vector.load %arg3[%c12, %c0_97, %c0_98] : memref<16x4x4xf32, #tpu.memory_space<vmem>>, vector<1x4x4xf32>
    %89 = vector.shape_cast %88 : vector<1x4x4xf32> to vector<4x4xf32>
    %cst_99 = arith.constant dense<0.000000e+00> : vector<4x128xf32>
    %90 = tpu.matmul %89, %14, %cst_99 {dimension_numbers = #tpu.dot_dimension_numbers<[1], [0], [0], [1], [0, 0, 1, 1], [], []>} : vector<4x4xf32>, vector<4x128xf32>, vector<4x128xf32> -> vector<4x128xf32>
    %c13 = arith.constant 13 : index
    %c0_100 = arith.constant 0 : index
    %c0_101 = arith.constant 0 : index
    %91 = vector.load %arg3[%c13, %c0_100, %c0_101] : memref<16x4x4xf32, #tpu.memory_space<vmem>>, vector<1x4x4xf32>
    %92 = vector.shape_cast %91 : vector<1x4x4xf32> to vector<4x4xf32>
    %cst_102 = arith.constant dense<0.000000e+00> : vector<4x128xf32>
    %93 = tpu.matmul %92, %17, %cst_102 {dimension_numbers = #tpu.dot_dimension_numbers<[1], [0], [0], [1], [0, 0, 1, 1], [], []>} : vector<4x4xf32>, vector<4x128xf32>, vector<4x128xf32> -> vector<4x128xf32>
    %94 = arith.addf %90, %93 : vector<4x128xf32>
    %c14 = arith.constant 14 : index
    %c0_103 = arith.constant 0 : index
    %c0_104 = arith.constant 0 : index
    %95 = vector.load %arg3[%c14, %c0_103, %c0_104] : memref<16x4x4xf32, #tpu.memory_space<vmem>>, vector<1x4x4xf32>
    %96 = vector.shape_cast %95 : vector<1x4x4xf32> to vector<4x4xf32>
    %cst_105 = arith.constant dense<0.000000e+00> : vector<4x128xf32>
    %97 = tpu.matmul %96, %23, %cst_105 {dimension_numbers = #tpu.dot_dimension_numbers<[1], [0], [0], [1], [0, 0, 1, 1], [], []>} : vector<4x4xf32>, vector<4x128xf32>, vector<4x128xf32> -> vector<4x128xf32>
    %98 = arith.addf %94, %97 : vector<4x128xf32>
    %c15 = arith.constant 15 : index
    %c0_106 = arith.constant 0 : index
    %c0_107 = arith.constant 0 : index
    %99 = vector.load %arg3[%c15, %c0_106, %c0_107] : memref<16x4x4xf32, #tpu.memory_space<vmem>>, vector<1x4x4xf32>
    %100 = vector.shape_cast %99 : vector<1x4x4xf32> to vector<4x4xf32>
    %cst_108 = arith.constant dense<0.000000e+00> : vector<4x128xf32>
    %101 = tpu.matmul %100, %26, %cst_108 {dimension_numbers = #tpu.dot_dimension_numbers<[1], [0], [0], [1], [0, 0, 1, 1], [], []>} : vector<4x4xf32>, vector<4x128xf32>, vector<4x128xf32> -> vector<4x128xf32>
    %102 = arith.addf %98, %101 : vector<4x128xf32>
    %103 = vector.broadcast %27 : vector<4x1xf32> to vector<4x128xf32>
    %104 = arith.addf %102, %103 : vector<4x128xf32>
    %c0_109 = arith.constant 0 : index
    %c0_110 = arith.constant 0 : index
    %c3_111 = arith.constant 3 : index
    %c0_112 = arith.constant 0 : index
    %c0_113 = arith.constant 0 : index
    %105 = vector.load %arg5[%c0_109, %c0_110, %c3_111, %c0_112, %c0_113] : memref<1x1x4x4x128xf32, #tpu.memory_space<vmem>>, vector<1x1x1x4x128xf32>
    %106 = vector.shape_cast %105 : vector<1x1x1x4x128xf32> to vector<4x128xf32>
    %107 = vector.shape_cast %104 : vector<4x128xf32> to vector<1x1x1x4x128xf32>
    tpu.vector_store %arg5[%c0_109, %c0_110, %c3_111, %c0_112, %c0_113], %107 {strides = array<i32>} : memref<1x1x4x4x128xf32, #tpu.memory_space<vmem>>, vector<1x1x1x4x128xf32>,
    return
  }
  func.func @transform_0(%arg0: i32, %arg1: i32) -> (i32, i32, i32, i32, i32) {
    %c0_i32 = arith.constant 0 : i32
    %c0_i32_0 = arith.constant 0 : i32
    %c0_i32_1 = arith.constant 0 : i32
    %c0_i32_2 = arith.constant 0 : i32
    return %arg0, %arg1, %c0_i32, %c0_i32_0, %c0_i32_1 : i32, i32, i32, i32, i32
  }
  func.func @transform_1(%arg0: i32, %arg1: i32) -> (i32, i32, i32) {
    %c0_i32 = arith.constant 0 : i32
    %c0_i32_0 = arith.constant 0 : i32
    %c0_i32_1 = arith.constant 0 : i32
    %c0_i32_2 = arith.constant 0 : i32
    return %c0_i32, %c0_i32_0, %c0_i32_1 : i32, i32, i32
  }
  func.func @transform_2(%arg0: i32, %arg1: i32) -> (i32, i32) {
    %c0_i32 = arith.constant 0 : i32
    %c0_i32_0 = arith.constant 0 : i32
    %c0_i32_1 = arith.constant 0 : i32
    return %c0_i32, %c0_i32_0 : i32, i32
  }
  func.func @transform_3(%arg0: i32, %arg1: i32) -> (i32, i32, i32, i32, i32) {
    %c0_i32 = arith.constant 0 : i32
    %c0_i32_0 = arith.constant 0 : i32
    %c0_i32_1 = arith.constant 0 : i32
    %c0_i32_2 = arith.constant 0 : i32
    return %arg0, %arg1, %c0_i32, %c0_i32_0, %c0_i32_1 : i32, i32, i32, i32, i32
  }
}

</mosaic_0001>

<bundles_post_ra>
// kernel: tpu_custom_call.1
= control target key start
LH: loop header
LB: loop body
LE: loop exit
PB: predicated region body
PF: predicated region fallthrough
CT: control target
= control target key end

     0   :  { %8 = vsyncpa [#allocation3], 0  ;;  %s3725_s0 = inlined_call_operand.vmem [shape: f32[2,2,4,10,18], index: 0, kind: input, shape index: {}]   ;;  %s3726_s1 = inlined_call_operand.vmem [shape: f32[16,4,4], index: 1, kind: input, shape index: {}]   ;;  %s3727_s2 = inlined_call_operand.vmem [shape: f32[4,1], index: 2, kind: input, shape index: {}]   ;;  %s3728_s3 = inlined_call_operand.hbm [shape: f32[2,2,4,4,128], index: 3, kind: output, shape index: {}]  }
   0x1   :  { %10 = vsyncpa [#allocation3 + $0x1], 0  ;;  %s2976_s12 = smov 0   ;;  %s2978_s13 = smov 0  }
   0x2   :  { %s2980_s14 = smov 0   ;;  %s2982_s15 = smov 0  }
   0x3   :  { %s2984_s16 = smov 0   ;;  %s2986_s17 = smov 0  }
   0x4   :  { %s2988_s18 = smov 0   ;;  %s2990_s19 = smov 0  }
   0x5 LB: > { %s2581_s20 = sadd.s32 4294967295, %s2938_s19   ;;  %s2582_s21 = sadd.s32 4294967294, %s2938_s19   ;;  %s2938_s19 = sphi %s2990_s19, %s16_s19   ;;  %s2934_s18 = sphi %s2988_s18, %s3737_s18   ;;  %s2930_s17 = sphi %s2986_s17, %s3736_s17   ;;  %s2926_s16 = sphi %s2984_s16, %s3735_s16   ;;  %s2922_s15 = sphi %s2982_s15, %s3734_s15   ;;  %s2918_s14 = sphi %s2980_s14, %s3733_s14   ;;  %s2914_s13 = sphi %s2978_s13, %s3732_s13   ;;  %s2910_s12 = sphi %s2976_s12, %s3731_s12  }
   0x6   : > { %s25_s22 = sadd.s32 1, %s2930_s17  ;;  %s28_s23 = sadd.s32 1, %s2934_s18 }
   0x7   : > { %p26_p0 = scmp.ge.s32.totalorder %s25_s22, 2  ;;  %p117_p1 = scmp.ne.s32.totalorder %s2918_s14, %s2914_s13 }
   0x8   : > { %p118_p2 = scmp.eq.s32.totalorder %s2581_s20, 3  ;;  %p123_p5 = scmp.ne.s32.totalorder %s2914_s13, %s2910_s12 }
   0x9   : > { %s3739_s22 = smov (%p26_p0, %s25_s22), 0  ;;  %s3741_s23 = smov (!%p26_p0, %s28_s23), %s2934_s18 }
   0xa   : > { %s103_s24 = ssub.s32 %s2930_s17, %s3739_s22  ;;  %p3027_p3 = por %p118_p2, %p117_p1 }
   0xb   : > { %p30_p4 = scmp.ge.s32.totalorder %s3741_s23, 2  ;;  %p124_p6 = scmp.eq.s32.totalorder %s2582_s21, 3 }
   0xc   : > { %p2585_p7 = scmp.ge.s32.totalorder %s2938_s19, 1  ;;  %p160_p9 = scmp.lt.s32.totalorder %s2938_s19, 5 }
   0xd   : > { %s3743_s23 = smov (%p30_p4, %s3741_s23), 0  ;;  %p3036_p8 = por %p124_p6, %p123_p5 }
   0xe   : > { %s102_s27 = ssub.s32 %s2934_s18, %s3743_s23  ;;  %s107_s28 = sadd.s32 1, %s2918_s14 }
   0xf   : > { %s104_s29 = sor.u32 %s103_s24, %s102_s27  ;;  %p161_p10 = pnand %p2585_p7, %p160_p9 }
  0x10   : > { %p105_p11 = scmp.eq.s32.totalorder %s104_s29, 0  ;;  %p188_p12 = scmp.lt.s32.totalorder (!%p161_p10), %s2926_s16, 1 }
  0x11   : > { %164 = sbr.rel (%p161_p10) target bundleno = 587 (0x24b), region = 32  ;;  %p190_p13 = scmp.lt.s32.totalorder (!%p161_p10), %s2922_s15, 1 }
  0x12   : > { %s3045_s30 = scalar_select %p105_p11, %s2918_s14, %s107_s28  }
  0x13   : > { %s2941_s21 = smov (!%p161_p10), 127   ;;  %s2942_s24 = smov (!%p161_p10), 126  }
  0x14   : > { %s2945_s27 = smov (!%p161_p10), 16   ;;  %s2946_s28 = smov (!%p161_p10), 64  }
  0x15   : > { %s2947_s29 = smov (!%p161_p10), 32  }
  0x16   : > { %s189_s4 = scalar_select %p188_p12, %s2926_s16, 1  ;;  %v2940_v0 = vmov 0.0   ;;  %v2943_v15 = vmov 1983009808   ;;  %v206_v17 = vlaneseq  ;;  %v2944_v20 = vmov 1934713408  }
  0x17   : > { %2683 = vmatprep.subr.mxu1 %v2940_v0  ;;  %2678 = vmatprep.subr.mxu0 %v2940_v0  ;;  %s191_s5 = scalar_select %p190_p13, %s2922_s15, 1  ;;  %v204_v16 = vunpack.c.l.s4 %v2943_v15  ;;  %v236_v21 = vunpack.c.l.s4 %v2944_v20  ;;  %vm2952_vm0 = vmmov 0   ;;  %vm297_vm1 = vcmask 130048  }
  0x18   : > { %s2588_s6 = sshll.u32 %s189_s4, 4  ;;  %v207_v19 = vshrl.u32 %v206_v17, 7  ;;  %s2948_s4 = smov 48   ;;  %2680 = vmatprep.mubr.msk.f32.mxu0 %vm2952_vm0, %v2940_v0  ;;  %2685 = vmatprep.mubr.msk.f32.mxu1 %vm2952_vm0, %v2940_v0  ;;  %vm299_vm2 = vcmask 261120   ;;  %vm301_vm3 = vcmask 392192   ;;  %vm303_vm4 = vcmask 523264  }
  0x19   : > { %s2587_s7 = sshll.u32 %s191_s5, 3  ;;  %v205_v18 = vunpack.c.0.s8 %v204_v16  ;;  %v237_v26 = vunpack.c.0.s8 %v236_v21  ;;  %s2949_s5 = smov 112   ;;  %vm305_vm5 = vcmask 654336   ;;  %vm307_vm6 = vcmask 785408  }
  0x1a   : > { %s194_s8 = sadd.s32 %s2588_s6, %s2587_s7  ;;  %s2950_s6 = smov 80   ;;  %vm309_vm7 = vcmask 916480   ;;  %vm1235_vm8 = vcmask 1043456   ;;  %vm1231_vm9 = vcmask 31744  }
  0x1b   : > { %s2589_s9 = sshll.u32 %s194_s8, 3  ;;  %v3082_v22 = vsub.s32 %v205_v18, %v207_v19  ;;  %v3092_v30 = vsub.s32 %v237_v26, %v207_v19  ;;  %s2951_s7 = smov 96  }
  0x1c   : > { %s196_s20 = scalar_lea.vmem %s3725_s0, %s2589_s9 }
  0x1d   : > { %v199_v1 = vld [vmem:[%s196_s20 + $0x20] sm:$0xff]  ;;  %v200_v3 = vld [vmem:[%s196_s20 + $0x30] sm:$0xff] }
  0x1e   : > { %v197_v2 = vld [vmem:[%s196_s20] sm:$0xff]  ;;  %319 = vrot.lane.b32.xlu1 %v199_v1, %s2941_s21  ;;  %v198_v4 = vld [vmem:[%s196_s20 + $0x10] sm:$0xff] }
  0x1f   : > { %315 = vrot.lane.b32.xlu0 %v197_v2, %s2941_s21  ;;  %v3058_v5 = vld [vmem:[%s196_s20 + $0x12] sm:$0xff]  ;;  %v3066_v8 = vld [vmem:[%s196_s20 + $0x2] sm:$0xff]  ;;  %v201_v23 = vcombine.low %v197_v2, %v199_v1  ;;  %v217_v24 = vcombine.low %v198_v4, %v200_v3  ;;  %v202_v25 = vcombine.high %v197_v2, %v199_v1  ;;  %v218_v28 = vcombine.high %v198_v4, %v200_v3 }
  0x20   : > { %v3060_v6 = vld [vmem:[%s196_s20 + $0x32] sm:$0xff]  ;;  %v3068_v9 = vld [vmem:[%s196_s20 + $0x22] sm:$0xff] }
  0x21   : > { %v907_v7 = vcombine.high %v3058_v5, %v3060_v6  ;;  %v546_v10 = vld [vmem:[%s196_s20 + $0x11] sm:$0xff]  ;;  %v545_v11 = vld [vmem:[%s196_s20 + $0x1] sm:$0xff]  ;;  %v891_v12 = vcombine.high %v3066_v8, %v3068_v9  ;;  %v209_v27 = vrot.slane %v201_v23, %v3082_v22  ;;  %v225_v29 = vrot.slane %v217_v24, %v3082_v22 }
  0x22   : > { %321 = vrot.lane.b32.xlu1 %v200_v3, %s2941_s21  ;;  %v548_v13 = vld [vmem:[%s196_s20 + $0x31] sm:$0xff]  ;;  %v547_v14 = vld [vmem:[%s196_s20 + $0x21] sm:$0xff]  ;;  %v216_v32 = vrot.slane %v202_v25, %v3082_v22  ;;  %v232_v33 = vrot.slane %v218_v28, %v3082_v22  ;;  %v906_v60 = vcombine.low %v3058_v5, %v3060_v6  ;;  %v890_v61 = vcombine.low %v3066_v8, %v3068_v9 }
  0x23   : > { %317 = vrot.lane.b32.xlu0 %v198_v4, %s2941_s21  ;;  %v233_v31 = vcombine.low %v209_v27, %v225_v29  ;;  %v565_v34 = vcombine.low %v546_v10, %v548_v13  ;;  %v549_v35 = vcombine.low %v545_v11, %v547_v14  ;;  %v550_v36 = vcombine.high %v545_v11, %v547_v14 }
  0x24   : > { %v566_v37 = vcombine.high %v546_v10, %v548_v13  ;;  %v249_v39 = vcombine.low %v216_v32, %v232_v33  ;;  %v234_v42 = vcombine.high %v209_v27, %v225_v29  ;;  %v250_v52 = vcombine.high %v216_v32, %v232_v33 }
  0x25   : > { %v3105_v38 = vrot.slane %v233_v31, %v3092_v30  ;;  %v573_v40 = vrot.slane %v565_v34, %v3082_v22  ;;  %v557_v41 = vrot.slane %v549_v35, %v3082_v22  ;;  %v564_v44 = vrot.slane %v550_v36, %v3082_v22 }
  0x26   : > { %658 = vrot.lane.b32.xlu1 %v546_v10, %s2941_s21  ;;  %v257_v46 = vrot.slane %v249_v39, %v3092_v30  ;;  %v580_v47 = vrot.slane %v566_v37, %v3082_v22  ;;  %v248_v48 = vrot.slane %v234_v42, %v3092_v30  ;;  %v264_v56 = vrot.slane %v250_v52, %v3092_v30 }
  0x27   : > { %656 = vrot.lane.b32.xlu0 %v545_v11, %s2941_s21  ;;  %v582_v43 = vcombine.high %v557_v41, %v573_v40  ;;  %v265_v45 = vcombine.high %v3105_v38, %v2940_v0  ;;  %v581_v49 = vcombine.low %v557_v41, %v573_v40 }
  0x28   : > { %v597_v51 = vcombine.low %v564_v44, %v580_v47  ;;  %v266_v54 = vcombine.high %v248_v48, %v2940_v0  ;;  %v268_v58 = vcombine.high %v264_v56, %v2940_v0  ;;  %v598_v59 = vcombine.high %v564_v44, %v580_v47 }
  0x29   : > { %v596_v50 = vrot.slane %v582_v43, %v3092_v30  ;;  %v3123_v53 = vrot.slane %v581_v49, %v3092_v30  ;;  %v267_v62 = vcombine.high %v257_v46, %v2940_v0 }
  0x2a   : > { %662 = vrot.lane.b32.xlu1 %v548_v13, %s2941_s21  ;;  %v605_v55 = vrot.slane %v597_v51, %v3092_v30 }
  0x2b   : > { %660 = vrot.lane.b32.xlu0 %v547_v14, %s2941_s21  ;;  %v613_v57 = vcombine.high %v3123_v53, %v2940_v0 }
  0x2c   : > { %v615_v63 = vcombine.high %v605_v55, %v2940_v0 }
  0x2e   : > { %432 = vrot.lane.b32.xlu1 %v198_v4, %s2942_s24  ;;  %v3150_v4 = vrot.slane %v891_v12, %v3082_v22 }
  0x2f   : > { %430 = vrot.lane.b32.xlu0 %v197_v2, %s2942_s24  ;;  %v898_v2 = vrot.slane %v890_v61, %v3082_v22 }
  0x32   : > { %436 = vrot.lane.b32.xlu1 %v200_v3, %s2942_s24  ;;  %v914_v3 = vrot.slane %v906_v60, %v3082_v22 }
  0x33   : > { %434 = vrot.lane.b32.xlu0 %v199_v1, %s2942_s24  ;;  %v612_v1 = vrot.slane %v598_v59, %v3092_v30 }
  0x36   : > { %773 = vrot.lane.b32.xlu1 %v546_v10, %s2942_s24  ;;  %v3156_v10 = vrot.slane %v907_v7, %v3082_v22 }
  0x37   : > { %771 = vrot.lane.b32.xlu0 %v545_v11, %s2942_s24  ;;  %v614_v11 = vcombine.high %v596_v50, %v2940_v0 }
  0x3a   : > { %777 = vrot.lane.b32.xlu1 %v548_v13, %s2942_s24  ;;  %v616_v13 = vcombine.high %v612_v1, %v2940_v0 }
  0x3b   : > { %775 = vrot.lane.b32.xlu0 %v547_v14, %s2942_s24  ;;  %v923_v14 = vcombine.high %v898_v2, %v914_v3 }
  0x3e   : > { %999 = vrot.lane.b32.xlu1 %v3058_v5, %s2941_s21 }
  0x3f   : > { %997 = vrot.lane.b32.xlu0 %v3066_v8, %s2941_s21 }
  0x42   : > { %1003 = vrot.lane.b32.xlu1 %v3060_v6, %s2941_s21 }
  0x43   : > { %1001 = vrot.lane.b32.xlu0 %v3068_v9, %s2941_s21 }
  0x46   : > { %1114 = vrot.lane.b32.xlu1 %v3058_v5, %s2942_s24  ;;  %v3167_v5 = vrot.slane %v923_v14, %v3092_v30 }
  0x47   : > { %1112 = vrot.lane.b32.xlu0 %v3066_v8, %s2942_s24  ;;  %v938_v8 = vcombine.low %v3150_v4, %v3156_v10 }
  0x4a   : > { %1118 = vrot.lane.b32.xlu1 %v3060_v6, %s2942_s24  ;;  %v922_v6 = vcombine.low %v898_v2, %v914_v3 }
  0x4b   : > { %1116 = vrot.lane.b32.xlu0 %v3068_v9, %s2942_s24  ;;  %v939_v9 = vcombine.high %v3150_v4, %v3156_v10  ;;  %s2954_s24 = smov [#allocation2]  }
  0x4c   : > { %v3173_v7 = vrot.slane %v922_v6, %v3092_v30 }
  0x4e   : > { %282 = vrot.lane.b32.xlu1 %v257_v46, %s2946_s28  ;;  %v954_v12 = vcombine.high %v3173_v7, %v2940_v0 }
  0x4f   : > { %270 = vrot.lane.b32.xlu0 %v265_v45, %s2945_s27 }
  0x52   : > { %622 = vrot.lane.b32.xlu1 %v596_v50, %s2947_s29 }
  0x53   : > { %274 = vrot.lane.b32.xlu0 %v248_v48, %s2947_s29 }
  0x56   : > { %630 = vrot.lane.b32.xlu1 %v605_v55, %s2946_s28 }
  0x57   : > { %278 = vrot.lane.b32.xlu0 %v266_v54, %s2948_s4 }
  0x5a   : > { %294 = vrot.lane.b32.xlu1 %v268_v58, %s2949_s5 }
  0x5b   : > { %618 = vrot.lane.b32.xlu0 %v613_v57, %s2945_s27 }
  0x5e   : > { %634 = vrot.lane.b32.xlu1 %v615_v63, %s2950_s6 }
  0x5f   : > { %286 = vrot.lane.b32.xlu0 %v267_v62, %s2950_s6 }
  0x62   : > { %642 = vrot.lane.b32.xlu1 %v616_v13, %s2949_s5 }
  0x63   : > { %626 = vrot.lane.b32.xlu0 %v614_v11, %s2948_s4 }
  0x66   : > { %963 = vrot.lane.b32.xlu1 %v3167_v5, %s2947_s29 }
  0x67   : > { %290 = vrot.lane.b32.xlu0 %v264_v56, %s2951_s7 }
  0x6b   : > { %638 = vrot.lane.b32.xlu0 %v612_v1, %s2951_s7 }
  0x6f   : > { %959 = vrot.lane.b32.xlu0 %v954_v12, %s2945_s27 }
  0x90   : > { %v320_v15 = vpop.permute.xlu1 %319 }
  0x91   : > { %v316_v16 = vpop.permute.xlu0 %315 }
  0x92   : > { %v327_v17 = vcombine.low %v316_v16, %v320_v15  ;;  %v328_v18 = vcombine.high %v316_v16, %v320_v15 }
  0x94   : > { %v322_v19 = vpop.permute.xlu1 %321  ;;  %v3182_v24 = vrot.slane %v327_v17, %v3082_v22  ;;  %v342_v25 = vrot.slane %v328_v18, %v3082_v22 }
  0x95   : > { %v318_v20 = vpop.permute.xlu0 %317 }
  0x96   : > { %v343_v21 = vcombine.low %v318_v20, %v322_v19  ;;  %v344_v23 = vcombine.high %v318_v20, %v322_v19 }
  0x98   : > { %v3186_v26 = vrot.slane %v343_v21, %v3082_v22  ;;  %v358_v27 = vrot.slane %v344_v23, %v3082_v22  ;;  %v659_v28 = vpop.permute.xlu1 %658 }
  0x99   : > { %v657_v29 = vpop.permute.xlu0 %656 }
  0x9a   : > { %v360_v31 = vcombine.high %v3182_v24, %v3186_v26  ;;  %v376_v32 = vcombine.high %v342_v25, %v358_v27  ;;  %v375_v33 = vcombine.low %v342_v25, %v358_v27 }
  0x9c   : > { %v3192_v34 = vrot.slane %v360_v31, %v3092_v30  ;;  %v3195_v35 = vrot.slane %v376_v32, %v3092_v30  ;;  %v663_v36 = vpop.permute.xlu1 %662  ;;  %v3202_v43 = vrot.slane %v375_v33, %v3092_v30 }
  0x9d   : > { %v661_v37 = vpop.permute.xlu0 %660  ;;  %v684_v39 = vcombine.low %v659_v28, %v663_v36  ;;  %v685_v40 = vcombine.high %v659_v28, %v663_v36 }
  0x9e   : > { %v668_v41 = vcombine.low %v657_v29, %v661_v37  ;;  %v669_v42 = vcombine.high %v657_v29, %v661_v37  ;;  %400 = vrot.lane.b32.xlu1 %v3192_v34, %s2947_s29  ;;  %416 = vrot.lane.b32.xlu0 %v3195_v35, %s2951_s7 }
  0x9f   : > { %v3205_v44 = vrot.slane %v684_v39, %v3082_v22  ;;  %v699_v45 = vrot.slane %v685_v40, %v3082_v22 }
  0xa0   : > { %v3209_v46 = vrot.slane %v668_v41, %v3082_v22  ;;  %v683_v47 = vrot.slane %v669_v42, %v3082_v22  ;;  %v433_v48 = vpop.permute.xlu1 %432  ;;  %v359_v41 = vcombine.low %v3182_v24, %v3186_v26  ;;  %v392_v24 = vcombine.high %v3192_v34, %v2940_v0 }
  0xa1   : > { %v431_v49 = vpop.permute.xlu0 %430 }
  0xa2   : > { %v701_v50 = vcombine.high %v3209_v46, %v3205_v44  ;;  %408 = vrot.lane.b32.xlu1 %v3202_v43, %s2946_s28  ;;  %v717_v51 = vcombine.high %v683_v47, %v699_v45  ;;  %v716_v3 = vcombine.low %v683_v47, %v699_v45  ;;  %v700_v34 = vcombine.low %v3209_v46, %v3205_v44 }
  0xa3   : > { %v394_v44 = vcombine.high %v3195_v35, %v2940_v0 }
  0xa4   : > { %v3217_v52 = vrot.slane %v701_v50, %v3092_v30  ;;  %v437_v54 = vpop.permute.xlu1 %436  ;;  %v3224_v62 = vrot.slane %v717_v51, %v3092_v30  ;;  %v3236_v20 = vrot.slane %v716_v3, %v3092_v30  ;;  %v3281_v51 = vrot.slane %v359_v41, %v3092_v30 }
  0xa5   : > { %v435_v55 = vpop.permute.xlu0 %434  ;;  %v458_v56 = vcombine.low %v433_v48, %v437_v54  ;;  %v459_v58 = vcombine.high %v433_v48, %v437_v54  ;;  %v3310_v46 = vrot.slane %v700_v34, %v3092_v30 }
  0xa6   : > { %v442_v57 = vcombine.low %v431_v49, %v435_v55  ;;  %741 = vrot.lane.b32.xlu0 %v3217_v52, %s2947_s29  ;;  %v443_v59 = vcombine.high %v431_v49, %v435_v55  ;;  %v733_v3 = vcombine.high %v3217_v52, %v2940_v0 }
  0xa7   : > { %v466_v60 = vrot.slane %v458_v56, %v3082_v22  ;;  %v473_v11 = vrot.slane %v459_v58, %v3082_v22  ;;  %v393_v56 = vcombine.high %v3202_v43, %v2940_v0 }
  0xa8   : > { %v450_v61 = vrot.slane %v442_v57, %v3082_v22  ;;  %v774_v63 = vpop.permute.xlu1 %773  ;;  %v457_v13 = vrot.slane %v443_v59, %v3082_v22  ;;  %v391_v57 = vcombine.high %v3281_v51, %v2940_v0 }
  0xa9   : > { %v772_v1 = vpop.permute.xlu0 %771 }
  0xaa   : > { %v475_v2 = vcombine.high %v450_v61, %v466_v60  ;;  %757 = vrot.lane.b32.xlu0 %v3224_v62, %s2951_s7  ;;  %v490_v19 = vcombine.low %v457_v13, %v473_v11  ;;  %v491_v32 = vcombine.high %v457_v13, %v473_v11  ;;  %v474_v50 = vcombine.low %v450_v61, %v466_v60 }
  0xac   : > { %v3231_v14 = vrot.slane %v475_v2, %v3092_v30  ;;  %v778_v6 = vpop.permute.xlu1 %777  ;;  %v498_v36 = vrot.slane %v490_v19, %v3092_v30  ;;  %v3262_v45 = vrot.slane %v491_v32, %v3092_v30  ;;  %v3299_v58 = vrot.slane %v474_v50, %v3092_v30 }
  0xad   : > { %v776_v12 = vpop.permute.xlu0 %775  ;;  %v799_v15 = vcombine.low %v774_v63, %v778_v6  ;;  %v800_v16 = vcombine.high %v774_v63, %v778_v6  ;;  %v732_v2 = vcombine.high %v3310_v46, %v2940_v0 }
  0xae   : > { %v783_v17 = vcombine.low %v772_v1, %v776_v12  ;;  %v784_v18 = vcombine.high %v772_v1, %v776_v12  ;;  %515 = vrot.lane.b32.xlu1 %v3231_v14, %s2947_s29  ;;  %v506_v43 = vcombine.high %v3299_v58, %v2940_v0  ;;  %v508_v13 = vcombine.high %v498_v36, %v2940_v0 }
  0xaf   : > { %v807_v21 = vrot.slane %v799_v15, %v3082_v22  ;;  %v814_v23 = vrot.slane %v800_v16, %v3082_v22  ;;  %v507_v6 = vcombine.high %v3231_v14, %v2940_v0 }
  0xb0   : > { %v791_v25 = vrot.slane %v783_v17, %v3082_v22  ;;  %v798_v27 = vrot.slane %v784_v18, %v3082_v22  ;;  %v3242_v28 = vpop.permute.xlu1 %999  ;;  %v734_v18 = vcombine.high %v3236_v20, %v2940_v0 }
  0xb1   : > { %v3244_v29 = vpop.permute.xlu0 %997 }
  0xb2   : > { %v816_v31 = vcombine.high %v791_v25, %v807_v21  ;;  %749 = vrot.lane.b32.xlu1 %v3236_v20, %s2946_s28  ;;  %v831_v33 = vcombine.low %v798_v27, %v814_v23  ;;  %v832_v42 = vcombine.high %v798_v27, %v814_v23  ;;  %v815_v1 = vcombine.low %v791_v25, %v807_v21 }
  0xb3   : > { %v735_v27 = vcombine.high %v3224_v62, %v2940_v0 }
  0xb4   : > { %v3250_v37 = vrot.slane %v816_v31, %v3092_v30  ;;  %v3252_v39 = vpop.permute.xlu1 %1003  ;;  %v3265_v47 = vrot.slane %v831_v33, %v3092_v30  ;;  %v3278_v26 = vrot.slane %v832_v42, %v3092_v30  ;;  %v3326_v12 = vrot.slane %v815_v1, %v3092_v30 }
  0xb5   : > { %v3254_v40 = vpop.permute.xlu0 %1001  ;;  %v1025_v19 = vcombine.low %v3242_v28, %v3252_v39 }
  0xb6   : > { %523 = vrot.lane.b32.xlu1 %v498_v36, %s2946_s28  ;;  %856 = vrot.lane.b32.xlu0 %v3250_v37, %s2947_s29  ;;  %v847_v14 = vcombine.high %v3326_v12, %v2940_v0  ;;  %v1009_v21 = vcombine.low %v3244_v29, %v3254_v40  ;;  %v848_v32 = vcombine.high %v3250_v37, %v2940_v0 }
  0xb7   : > { %v1033_v20 = vrot.slane %v1025_v19, %v3082_v22  ;;  %v509_v37 = vcombine.high %v3262_v45, %v2940_v0 }
  0xb8   : > { %v3269_v49 = vpop.permute.xlu1 %1114  ;;  %v1017_v31 = vrot.slane %v1009_v21, %v3082_v22 }
  0xb9   : > { %v3267_v48 = vpop.permute.xlu0 %1112 }
  0xba   : > { %531 = vrot.lane.b32.xlu1 %v3262_v45, %s2951_s7  ;;  %864 = vrot.lane.b32.xlu0 %v3265_v47, %s2946_s28  ;;  %v1041_v50 = vcombine.low %v1017_v31, %v1033_v20  ;;  %v1042_v1 = vcombine.high %v1017_v31, %v1033_v20 }
  0xbc   : > { %v3285_v55 = vpop.permute.xlu1 %1118 }
  0xbd   : > { %v3283_v54 = vpop.permute.xlu0 %1116  ;;  %v1141_v10 = vcombine.high %v3269_v49, %v3285_v55 }
  0xbe   : > { %404 = vrot.lane.b32.xlu1 %v392_v24, %s2948_s4  ;;  %872 = vrot.lane.b32.xlu0 %v3278_v26, %s2951_s7  ;;  %v849_v24 = vcombine.high %v3265_v47, %v2940_v0  ;;  %v1228_v47 = vld [vmem:[%s3726_s1] sm:$0xf]  ;;  %v1125_v4 = vcombine.high %v3267_v48, %v3283_v54 }
  0xc0   : > { %v283_v60 = vpop.permute.xlu1 %282 }
  0xc1   : > { %v271_v59 = vpop.permute.xlu0 %270 }
  0xc2   : > { %412 = vrot.lane.b32.xlu1 %v393_v56, %s2950_s6  ;;  %396 = vrot.lane.b32.xlu0 %v391_v57, %s2945_s27  ;;  %v298_v11 = vsel %vm297_vm1, %v3105_v38, %v271_v59  ;;  %v955_v57 = vcombine.high %v3167_v5, %v2940_v0  ;;  %v946_v5 = vrot.slane %v938_v8, %v3092_v30 }
  0xc4   : > { %v623_v63 = vpop.permute.xlu1 %622  ;;  %v956_v8 = vcombine.high %v946_v5, %v2940_v0 }
  0xc5   : > { %v275_v61 = vpop.permute.xlu0 %274 }
  0xc6   : > { %420 = vrot.lane.b32.xlu1 %v394_v44, %s2949_s5  ;;  %511 = vrot.lane.b32.xlu0 %v506_v43, %s2945_s27  ;;  %v300_v16 = vsel %vm299_vm2, %v298_v11, %v275_v61  ;;  %v3377_v44 = vrot.slane %v1041_v50, %v3092_v30  ;;  %v1026_v61 = vcombine.high %v3242_v28, %v3252_v39 }
  0xc7   : > { %v1124_v11 = vcombine.low %v3267_v48, %v3283_v54 }
  0xc8   : > { %v631_v15 = vpop.permute.xlu1 %630 }
  0xc9   : > { %v279_v35 = vpop.permute.xlu0 %278 }
  0xca   : > { %737 = vrot.lane.b32.xlu1 %v732_v2, %s2945_s27  ;;  %745 = vrot.lane.b32.xlu0 %v733_v3, %s2948_s4  ;;  %v302_v23 = vsel %vm301_vm3, %v300_v16, %v279_v35  ;;  %v1073_v2 = vcombine.high %v3377_v44, %v2940_v0 }
  0xcb   : > { %v304_v33 = vsel %vm303_vm4, %v302_v23, %v283_v60  ;;  %v850_v60 = vcombine.high %v3278_v26, %v2940_v0  ;;  %v1139_v23 = vrot.slane %v1125_v4, %v3082_v22 }
  0xcd   : > { %v619_v52 = vpop.permute.xlu0 %618 }
  0xce   : > { %527 = vrot.lane.b32.xlu1 %v508_v13, %s2950_s6  ;;  %519 = vrot.lane.b32.xlu0 %v507_v6, %s2948_s4  ;;  %v645_v38 = vsel %vm297_vm1, %v3123_v53, %v619_v52  ;;  %v295_v53 = vpop.permute.xlu1 %294  ;;  %v1056_v13 = vrot.slane %v1042_v1, %v3092_v30  ;;  %v1140_v6 = vcombine.low %v3269_v49, %v3285_v55 }
  0xcf   : > { %v646_v17 = vsel %vm299_vm2, %v645_v38, %v623_v63  ;;  %v1010_v63 = vcombine.high %v3244_v29, %v3254_v40  ;;  %v1040_v29 = vrot.slane %v1026_v61, %v3082_v22  ;;  %v1132_v52 = vrot.slane %v1124_v11, %v3082_v22 }
  0xd0   : > { %v1148_v16 = vrot.slane %v1140_v6, %v3082_v22  ;;  %v1074_v38 = vcombine.high %v1056_v13, %v2940_v0 }
  0xd1   : > { %v287_v25 = vpop.permute.xlu0 %286  ;;  %v1024_v39 = vrot.slane %v1010_v63, %v3082_v22 }
  0xd2   : > { %852 = vrot.lane.b32.xlu1 %v847_v14, %s2945_s27  ;;  %753 = vrot.lane.b32.xlu0 %v734_v18, %s2950_s6  ;;  %v306_v42 = vsel %vm305_vm5, %v304_v33, %v287_v25  ;;  %v3363_v34 = vpop.permute.xlu1 %634  ;;  %v1155_v25 = vrot.slane %v1141_v10, %v3082_v22 }
  0xd3   : > { %v1058_v14 = vcombine.high %v1024_v39, %v1040_v29 }
  0xd4   : > { %v1172_v48 = vcombine.low %v1139_v23, %v1155_v25  ;;  %v1173_v22 = vcombine.high %v1139_v23, %v1155_v25 }
  0xd5   : > { %v627_v36 = vpop.permute.xlu0 %626  ;;  %v1072_v21 = vrot.slane %v1058_v14, %v3092_v30 }
  0xd6   : > { %860 = vrot.lane.b32.xlu1 %v848_v32, %s2948_s4  ;;  %761 = vrot.lane.b32.xlu0 %v735_v27, %s2949_s5  ;;  %v647_v41 = vsel %vm301_vm3, %v646_v17, %v627_v36  ;;  %v3390_v26 = vpop.permute.xlu1 %642  ;;  %v1180_v31 = vrot.slane %v1172_v48, %v3092_v30  ;;  %v2953_v32 = vmov 0   ;;  %v1187_v36 = vrot.slane %v1173_v22, %v3092_v30 }
  0xd7   : > { %v3357_v62 = vsel %vm303_vm4, %v647_v41, %v631_v15  ;;  %v1057_v15 = vcombine.low %v1024_v39, %v1040_v29  ;;  %v1076_v49 = vcombine.high %v1072_v21, %v2940_v0  ;;  %2844 = vset.pattern.permute.xlu1 %v2953_v32  ;;  %2845 = vset.pattern.permute.xlu0 %v2953_v32 }
  0xd8   : > { %v1190_v33 = vcombine.high %v1180_v31, %v2940_v0  ;;  %v1191_v41 = vcombine.high %v1187_v36, %v2940_v0 }
  0xd9   : > { %v291_v56 = vpop.permute.xlu0 %290  ;;  %v1065_v18 = vrot.slane %v1057_v15, %v3092_v30 }
  0xda   : > { %868 = vrot.lane.b32.xlu1 %v849_v24, %s2950_s6  ;;  %535 = vrot.lane.b32.xlu0 %v509_v37, %s2949_s5  ;;  %v308_v59 = vsel %vm307_vm6, %v306_v42, %v291_v56  ;;  %v964_v35 = vpop.permute.xlu1 %963  ;;  %v1227_v42 = vld [vmem:[%s3727_s2] sm:$0xf] }
  0xdb   : > { %v310_v45 = vsel %vm309_vm7, %v308_v59, %v295_v53  ;;  %v1075_v19 = vcombine.high %v1065_v18, %v2940_v0  ;;  %v1157_v53 = vcombine.high %v1132_v52, %v1148_v16 }
  0xdc   : > { %2684 = vmatpush3.msk.msra.mxu1 %vm1235_vm8, %v310_v45 }
  0xdd   : > { %v3380_v43 = vpop.permute.xlu0 %638  ;;  %2686 = vmatmul.mubr.msk.f32.vlgmr.msra.gmra.mxu1 %vm1231_vm9, %v1228_v47  ;;  %2693 = vmatprep.subr.mxu1 %v2940_v0  ;;  %v1171_v55 = vrot.slane %v1157_v53, %v3092_v30 }
  0xde   : > { %876 = vrot.lane.b32.xlu1 %v850_v60, %s2949_s5  ;;  %967 = vrot.lane.b32.xlu0 %v955_v57, %s2948_s4 }
  0xdf   : > { %2695 = vmatprep.mubr.msk.f32.mxu1 %vm2952_vm0, %v2940_v0  ;;  %v1189_v20 = vcombine.high %v1171_v55, %v2940_v0 }
  0xe1   : > { %v960_v3 = vpop.permute.xlu0 %959 }
  0xe2   : > { %1078 = vrot.lane.b32.xlu1 %v1073_v2, %s2945_s27  ;;  %971 = vrot.lane.b32.xlu0 %v946_v5, %s2946_s28  ;;  %v986_v28 = vsel %vm297_vm1, %v3173_v7, %v960_v3  ;;  %v953_v7 = vrot.slane %v939_v9, %v3092_v30  ;;  %v1156_v9 = vcombine.low %v1132_v52, %v1148_v16 }
  0xe3   : > { %v3408_v40 = vsel %vm299_vm2, %v986_v28, %v964_v35  ;;  %v649_v35 = vsel %vm305_vm5, %v3357_v62, %v3363_v34 }
  0xe4   : > { %v957_v17 = vcombine.high %v953_v7, %v2940_v0  ;;  %v3439_v27 = vrot.slane %v1156_v9, %v3092_v30  ;;  %v650_v6 = vsel %vm307_vm6, %v649_v35, %v3380_v43 }
  0xe5   : > { %v3484_v52 = vsel %vm309_vm7, %v650_v6, %v3390_v26  ;;  %v2595_v26 = vld [vmem:[%s3726_s1 + $0x8] sm:$0xf] }
  0xe6   : > { %1082 = vrot.lane.b32.xlu1 %v1056_v13, %s2947_s29  ;;  %975 = vrot.lane.b32.xlu0 %v956_v8, %s2950_s6  ;;  %v1188_v54 = vcombine.high %v3439_v27, %v2940_v0 }
  0xea   : > { %1086 = vrot.lane.b32.xlu1 %v1074_v38, %s2948_s4  ;;  %979 = vrot.lane.b32.xlu0 %v953_v7, %s2951_s7 }
  0xee   : > { %1090 = vrot.lane.b32.xlu1 %v1065_v18, %s2946_s28  ;;  %983 = vrot.lane.b32.xlu0 %v957_v17, %s2949_s5 }
  0xf2   : > { %1094 = vrot.lane.b32.xlu1 %v1075_v19, %s2950_s6  ;;  %1098 = vrot.lane.b32.xlu0 %v1072_v21, %s2951_s7 }
  0xf6   : > { %1102 = vrot.lane.b32.xlu1 %v1076_v49, %s2949_s5  ;;  %1193 = vrot.lane.b32.xlu0 %v1188_v54, %s2945_s27  ;;  %v2598_v54 = vld [vmem:[%s3726_s1 + $0xc] sm:$0xf]  ;;  %s2850_s27 = sshll.u32 %s2954_s24, 4  ;;  %s2851_s27 = int_to_ptr.vmem [resolvable:$false] %s2850_s27 }
  0xfa   : > { %1197 = vrot.lane.b32.xlu1 %v1171_v55, %s2947_s29  ;;  %1201 = vrot.lane.b32.xlu0 %v1189_v20, %s2948_s4  ;;  %s185_s29 = sand.u32 1, %s2914_s13  }
  0xfb   : > { %s2586_s4 = sshll.u32 %s185_s29, 4 }
  0xfe   : > { %1205 = vrot.lane.b32.xlu1 %v1180_v31, %s2946_s28  ;;  %1209 = vrot.lane.b32.xlu0 %v1190_v33, %s2950_s6  ;;  %s2641_s6 = sshll.u32 %s2922_s15, 2 }
 0x102   : > { %1213 = vrot.lane.b32.xlu1 %v1187_v36, %s2951_s7  ;;  %1217 = vrot.lane.b32.xlu0 %v1191_v41, %s2949_s5  ;;  %v2602_v36 = vld [vmem:[%s3726_s1 + $0x14] sm:$0xf]  ;;  %s3654_s5 = scalar_lea.vmem [#allocation2], %s2586_s4  ;;  %s2642_s7 = sshll.u32 %s2926_s16, 3 }
 0x103   : > { %s2493_s8 = sadd.s32 %s2642_s7, %s2641_s6  ;;  %s2496_s9 = sshll.u32 %s3654_s5, 4  ;;  %s3662_s9 = int_to_ptr.vmem [resolvable:$true] %s2496_s9 }
 0x104   : > { %s2643_s10 = sshll.u32 %s2493_s8, 6  ;;  %s3672_s16 = scalar_lea.sflag [#allocation3], %s185_s29 }
 0x105   : > { %s3667_s15 = scalar_lea.hbm %s3728_s3, %s2643_s10  ;;  %s2846_s21 = scalar_lea.vmem %s3662_s9, 256 }
 0x106   : > { %1545 = vperm.xlu1 %2844, %v1227_v42   ;;  %p2847_p0 = scmp.ne.s32.totalorder %s3662_s9, %s2846_s21  ;;  %s2852_s4 = scalar_lea.vmem %s2851_s27, 512 }
 0x107   : > { %p2853_p4 = scmp.lt.s32.totalorder %s3662_s9, %s2851_s27  ;;  %p2854_p5 = scmp.lt.s32.totalorder %s2852_s4, %s2846_s21 }
 0x108   : > { %p2848_p1 = pnand %p2847_p0, %p3027_p3 }
 0x109   : > { %p2855_p6 = por %p2854_p5, %p2853_p4 }
 0x10a   : > { %p2849_p2 = pneg %p2848_p1 }
 0x10c   : > { %p2856_p7 = pnand %p2855_p6, %p2849_p2 }
 0x110   : > { %v401_v50 = vpop.permute.xlu1 %400  ;;  %v417_v24 = vpop.permute.xlu0 %416 }
 0x114   : > { %v409_v37 = vpop.permute.xlu1 %408 }
 0x118   : > { %v742_v56 = vpop.permute.xlu0 %741 }
 0x11c   : > { %v758_v57 = vpop.permute.xlu0 %757 }
 0x120   : > { %v516_v30 = vpop.permute.xlu1 %515 }
 0x124   : > { %v750_v59 = vpop.permute.xlu1 %749 }
 0x128   : > { %v524_v47 = vpop.permute.xlu1 %523  ;;  %v857_v45 = vpop.permute.xlu0 %856 }
 0x12c   : > { %v532_v60 = vpop.permute.xlu1 %531  ;;  %v865_v5 = vpop.permute.xlu0 %864 }
 0x130   : > { %v405_v61 = vpop.permute.xlu1 %404  ;;  %v3463_v63 = vpop.permute.xlu0 %872 }
 0x134   : > { %v413_v1 = vpop.permute.xlu1 %412  ;;  %v397_v2 = vpop.permute.xlu0 %396 }
 0x135   : > { %v423_v3 = vsel %vm297_vm1, %v3281_v51, %v397_v2  ;;  %v2590_v51 = vld [vmem:[%s3726_s1 + $0x4] sm:$0xf] }
 0x136   : > { %v424_v8 = vsel %vm299_vm2, %v423_v3, %v401_v50  ;;  %v2601_v50 = vld [vmem:[%s3726_s1 + $0x10] sm:$0xf] }
 0x137   : > { %v425_v28 = vsel %vm301_vm3, %v424_v8, %v405_v61 }
 0x138   : > { %v421_v29 = vpop.permute.xlu1 %420  ;;  %v512_v39 = vpop.permute.xlu0 %511  ;;  %v426_v11 = vsel %vm303_vm4, %v425_v28, %v409_v37 }
 0x139   : > { %v427_v13 = vsel %vm305_vm5, %v426_v11, %v413_v1  ;;  %v538_v38 = vsel %vm297_vm1, %v3299_v58, %v512_v39  ;;  %v2620_v11 = vld [vmem:[%s3726_s1 + $0x28] sm:$0xf] }
 0x13a   : > { %v428_v7 = vsel %vm307_vm6, %v427_v13, %v417_v24  ;;  %v539_v18 = vsel %vm299_vm2, %v538_v38, %v516_v30  ;;  %v2607_v30 = vld [vmem:[%s3726_s1 + $0x18] sm:$0xf] }
 0x13b   : > { %v429_v15 = vsel %vm309_vm7, %v428_v7, %v421_v29 }
 0x13c   : > { %v738_v62 = vpop.permute.xlu1 %737  ;;  %2679 = vmatpush3.msk.msra.mxu0 %vm1235_vm8, %v429_v15  ;;  %v746_v34 = vpop.permute.xlu0 %745 }
 0x13d   : > { %v764_v16 = vsel %vm297_vm1, %v3310_v46, %v738_v62  ;;  %2688 = vmatprep.subr.mxu0 %v2940_v0  ;;  %2681 = vmatmul.mubr.msk.f32.vlgmr.msra.gmra.mxu0 %vm1231_vm9, %v2590_v51 }
 0x13e   : > { %v765_v43 = vsel %vm299_vm2, %v764_v16, %v742_v56  ;;  %2689 = vmatpush3.msk.msra.mxu0 %vm1235_vm8, %v3484_v52  ;;  %2690 = vmatprep.mubr.msk.f32.mxu0 %vm2952_vm0, %v2940_v0 }
 0x13f   : > { %2698 = vmatprep.subr.mxu0 %v2940_v0  ;;  %v766_v14 = vsel %vm301_vm3, %v765_v43, %v746_v34 }
 0x140   : > { %v528_v46 = vpop.permute.xlu1 %527  ;;  %v520_v17 = vpop.permute.xlu0 %519  ;;  %v767_v9 = vsel %vm303_vm4, %v766_v14, %v750_v59  ;;  %v2610_v59 = vld [vmem:[%s3726_s1 + $0x1c] sm:$0xf] }
 0x141   : > { %2691 = vmatmul.mubr.msk.f32.vlgmr.msra.gmra.mxu0 %vm1231_vm9, %v2595_v26  ;;  %v540_v4 = vsel %vm301_vm3, %v539_v18, %v520_v17  ;;  %v2623_v26 = vld [vmem:[%s3726_s1 + $0x2c] sm:$0xf] }
 0x142   : > { %2700 = vmatprep.mubr.msk.f32.mxu0 %vm2952_vm0, %v2940_v0  ;;  %v541_v23 = vsel %vm303_vm4, %v540_v4, %v524_v47  ;;  %v2627_v4 = vld [vmem:[%s3726_s1 + $0x30] sm:$0xf] }
 0x144   : > { %v853_v10 = vpop.permute.xlu1 %852  ;;  %v754_v19 = vpop.permute.xlu0 %753 }
 0x145   : > { %v879_v58 = vsel %vm297_vm1, %v3326_v12, %v853_v10  ;;  %v768_v21 = vsel %vm305_vm5, %v767_v9, %v754_v19  ;;  %v542_v12 = vsel %vm305_vm5, %v541_v23, %v528_v46  ;;  %v2633_v46 = vld [vmem:[%s3726_s1 + $0x38] sm:$0xf] }
 0x146   : > { %v880_v53 = vsel %vm299_vm2, %v879_v58, %v857_v45  ;;  %v769_v48 = vsel %vm307_vm6, %v768_v21, %v758_v57  ;;  %v543_v32 = vsel %vm307_vm6, %v542_v12, %v532_v60  ;;  %v2615_v60 = vld [vmem:[%s3726_s1 + $0x24] sm:$0xf] }
 0x148   : > { %v861_v25 = vpop.permute.xlu1 %860  ;;  %v762_v49 = vpop.permute.xlu0 %761 }
 0x149   : > { %v881_v55 = vsel %vm301_vm3, %v880_v53, %v861_v25  ;;  %v3519_v22 = vsel %vm309_vm7, %v769_v48, %v762_v49  ;;  %v2636_v48 = vld [vmem:[%s3726_s1 + $0x3c] sm:$0xf] }
 0x14a   : > { %2694 = vmatpush3.msk.msra.mxu1 %vm1235_vm8, %v3519_v22  ;;  %v882_v31 = vsel %vm303_vm4, %v881_v55, %v865_v5  ;;  %v2614_v5 = vld [vmem:[%s3726_s1 + $0x20] sm:$0xf] }
 0x14b   : > { %2703 = vmatprep.subr.mxu1 %v2940_v0  ;;  %2696 = vmatmul.mubr.msk.f32.vlgmr.msra.gmra.mxu1 %vm1231_vm9, %v2598_v54 }
 0x14c   : > { %v869_v20 = vpop.permute.xlu1 %868  ;;  %2704 = vmatpush3.msk.msra.mxu1 %vm1235_vm8, %v429_v15  ;;  %v536_v33 = vpop.permute.xlu0 %535  ;;  %2705 = vmatprep.mubr.msk.f32.mxu1 %vm2952_vm0, %v2940_v0 }
 0x14d   : > { %v883_v41 = vsel %vm305_vm5, %v882_v31, %v869_v20  ;;  %v544_v42 = vsel %vm309_vm7, %v543_v32, %v536_v33  ;;  %2713 = vmatprep.subr.mxu1 %v2940_v0 }
 0x14e   : > { %2699 = vmatpush3.msk.msra.mxu0 %vm1235_vm8, %v544_v42  ;;  %v884_v37 = vsel %vm307_vm6, %v883_v41, %v3463_v63 }
 0x14f   : > { %2701 = vmatmul.mubr.msk.f32.vlgmr.msra.gmra.mxu0 %vm1231_vm9, %v2602_v36  ;;  %2708 = vmatprep.subr.mxu0 %v2940_v0 }
 0x150   : > { %v877_v24 = vpop.permute.xlu1 %876  ;;  %2706 = vmatmul.mubr.msk.f32.vlgmr.msra.gmra.mxu1 %vm1231_vm9, %v2601_v50  ;;  %2709 = vmatpush3.msk.msra.mxu0 %vm1235_vm8, %v3519_v22  ;;  %v968_v56 = vpop.permute.xlu0 %967 }
 0x151   : > { %v885_v57 = vsel %vm309_vm7, %v884_v37, %v877_v24  ;;  %2710 = vmatprep.mubr.msk.f32.mxu0 %vm2952_vm0, %v2940_v0  ;;  %2718 = vmatprep.subr.mxu0 %v2940_v0  ;;  %v988_v3 = vsel %vm301_vm3, %v3408_v40, %v968_v56 }
 0x152   : > { %2714 = vmatpush3.msk.msra.mxu1 %vm1235_vm8, %v885_v57  ;;  %2715 = vmatprep.mubr.msk.f32.mxu1 %vm2952_vm0, %v2940_v0 }
 0x153   : > { %2711 = vmatmul.mubr.msk.f32.vlgmr.msra.gmra.mxu0 %vm1231_vm9, %v2607_v30  ;;  %2723 = vmatprep.subr.mxu1 %v2940_v0 }
 0x154   : > { %2719 = vmatpush3.msk.msra.mxu0 %vm1235_vm8, %v3519_v22  ;;  %v1079_v47 = vpop.permute.xlu1 %1078  ;;  %2716 = vmatmul.mubr.msk.f32.vlgmr.msra.gmra.mxu1 %vm1231_vm9, %v2610_v59  ;;  %v972_v45 = vpop.permute.xlu0 %971 }
 0x155   : > { %2724 = vmatpush3.msk.msra.mxu1 %vm1235_vm8, %v3484_v52  ;;  %2720 = vmatprep.mubr.msk.f32.mxu0 %vm2952_vm0, %v2940_v0  ;;  %v989_v8 = vsel %vm303_vm4, %v988_v3, %v972_v45  ;;  %v1105_v13 = vsel %vm297_vm1, %v3377_v44, %v1079_v47  ;;  %v2628_v44 = vld [vmem:[%s3726_s1 + $0x34] sm:$0xf] }
 0x156   : > { %2728 = vmatprep.subr.mxu0 %v2940_v0  ;;  %2725 = vmatprep.mubr.msk.f32.mxu1 %vm2952_vm0, %v2940_v0 }
 0x157   : > { %2721 = vmatmul.mubr.msk.f32.vlgmr.msra.gmra.mxu0 %vm1231_vm9, %v2615_v60  ;;  %2733 = vmatprep.subr.mxu1 %v2940_v0 }
 0x158   : > { %v1083_v61 = vpop.permute.xlu1 %1082  ;;  %v976_v63 = vpop.permute.xlu0 %975  ;;  %2730 = vmatprep.mubr.msk.f32.mxu0 %vm2952_vm0, %v2940_v0  ;;  %2726 = vmatmul.mubr.msk.f32.vlgmr.msra.gmra.mxu1 %vm1231_vm9, %v2614_v5 }
 0x159   : > { %2735 = vmatprep.mubr.msk.f32.mxu1 %vm2952_vm0, %v2940_v0  ;;  %v990_v35 = vsel %vm305_vm5, %v989_v8, %v976_v63  ;;  %v1106_v7 = vsel %vm299_vm2, %v1105_v13, %v1083_v61 }
 0x15c   : > { %v1087_v1 = vpop.permute.xlu1 %1086  ;;  %v980_v2 = vpop.permute.xlu0 %979 }
 0x15d   : > { %v991_v28 = vsel %vm307_vm6, %v990_v35, %v980_v2  ;;  %v1107_v40 = vsel %vm301_vm3, %v1106_v7, %v1087_v1 }
 0x160   : > { %v1091_v29 = vpop.permute.xlu1 %1090  ;;  %v984_v39 = vpop.permute.xlu0 %983 }
 0x161   : > { %v992_v6 = vsel %vm309_vm7, %v991_v28, %v984_v39  ;;  %v1108_v51 = vsel %vm303_vm4, %v1107_v40, %v1091_v29 }
 0x162   : > { %2729 = vmatpush3.msk.msra.mxu0 %vm1235_vm8, %v992_v6 }
 0x163   : > { %2738 = vmatprep.subr.mxu0 %v2940_v0  ;;  %2731 = vmatmul.mubr.msk.f32.vlgmr.msra.gmra.mxu0 %vm1231_vm9, %v2620_v11 }
 0x164   : > { %v1095_v15 = vpop.permute.xlu1 %1094  ;;  %2739 = vmatpush3.msk.msra.mxu0 %vm1235_vm8, %v885_v57  ;;  %v1099_v62 = vpop.permute.xlu0 %1098  ;;  %2740 = vmatprep.mubr.msk.f32.mxu0 %vm2952_vm0, %v2940_v0 }
 0x165   : > { %v1109_v34 = vsel %vm305_vm5, %v1108_v51, %v1095_v15  ;;  %2748 = vmatprep.subr.mxu0 %v2940_v0 }
 0x166   : > { %v1110_v52 = vsel %vm307_vm6, %v1109_v34, %v1099_v62 }
 0x167   : > { %2741 = vmatmul.mubr.msk.f32.vlgmr.msra.gmra.mxu0 %vm1231_vm9, %v2628_v44 }
 0x168   : > { %v1103_v16 = vpop.permute.xlu1 %1102  ;;  %v1194_v43 = vpop.permute.xlu0 %1193  ;;  %2750 = vmatprep.mubr.msk.f32.mxu0 %vm2952_vm0, %v2940_v0 }
 0x169   : > { %v1111_v38 = vsel %vm309_vm7, %v1110_v52, %v1103_v16  ;;  %v1220_v17 = vsel %vm297_vm1, %v3439_v27, %v1194_v43 }
 0x16a   : > { %2734 = vmatpush3.msk.msra.mxu1 %vm1235_vm8, %v1111_v38  ;;  %2749 = vmatpush3.msk.msra.mxu0 %vm1235_vm8, %v1111_v38 }
 0x16b   : > { %2743 = vmatprep.subr.mxu1 %v2940_v0  ;;  %2736 = vmatmul.mubr.msk.f32.vlgmr.msra.gmra.mxu1 %vm1231_vm9, %v2623_v26 }
 0x16c   : > { %v1198_v14 = vpop.permute.xlu1 %1197  ;;  %2744 = vmatpush3.msk.msra.mxu1 %vm1235_vm8, %v3519_v22  ;;  %v1202_v18 = vpop.permute.xlu0 %1201  ;;  %2745 = vmatprep.mubr.msk.f32.mxu1 %vm2952_vm0, %v2940_v0 }
 0x16d   : > { %v1221_v10 = vsel %vm299_vm2, %v1220_v17, %v1198_v14  ;;  %2753 = vmatprep.subr.mxu1 %v2940_v0  ;;  %2751 = vmatmul.mubr.msk.f32.vlgmr.msra.gmra.mxu0 %vm1231_vm9, %v2633_v46 }
 0x16e   : > { %v1222_v27 = vsel %vm301_vm3, %v1221_v10, %v1202_v18 }
 0x16f   : > { %2746 = vmatmul.mubr.msk.f32.vlgmr.msra.gmra.mxu1 %vm1231_vm9, %v2627_v4 }
 0x170   : > { %v1206_v9 = vpop.permute.xlu1 %1205  ;;  %v1210_v19 = vpop.permute.xlu0 %1209  ;;  %2755 = vmatprep.mubr.msk.f32.mxu1 %vm2952_vm0, %v2940_v0 }
 0x171   : > { %v1223_v58 = vsel %vm303_vm4, %v1222_v27, %v1206_v9 }
 0x172   : > { %v1224_v21 = vsel %vm305_vm5, %v1223_v58, %v1210_v19 }
 0x174   : > { %v1214_v23 = vpop.permute.xlu1 %1213  ;;  %v1218_v25 = vpop.permute.xlu0 %1217 }
 0x175   : > { %v1225_v53 = vsel %vm307_vm6, %v1224_v21, %v1214_v23 }
 0x176   : > { %v1226_v49 = vsel %vm309_vm7, %v1225_v53, %v1218_v25 }
 0x177   : > { %2754 = vmatpush3.msk.msra.mxu1 %vm1235_vm8, %v1226_v49 }
 0x178   : > { %2756 = vmatmul.mubr.msk.f32.vlgmr.msra.gmra.mxu1 %vm1231_vm9, %v2636_v48 }
 0x181   : > { %v1546_v36 = vpop.permute.xlu1 %1545 }
 0x19d   : > { %v1381_v0 = vpop.f32.mrf.mxu1 }
 0x19f   : > { %v2687_v54 = vpop.f32.mrf.mxu1 }
 0x1fd   : > { %v1305_v55 = vpop.f32.mrf.mxu0 }
 0x1fe   : > { %v1382_v31 = vadd.f32 %v1381_v0, %v1305_v55 }
 0x1ff   : > { %v2682_v22 = vpop.f32.mrf.mxu0 }
 0x201   : > { %v1459_v12 = vpop.f32.mrf.mxu0 }
 0x202   : > { %v1463_v32 = vadd.f32 %v1459_v12, %v1382_v31 }
 0x203   : > { %v2692_v20 = vpop.f32.mrf.mxu0 }
 0x20b   : > { %v1538_v33 = vpop.f32.mrf.mxu1 }
 0x20c   : > { %v1542_v41 = vadd.f32 %v1538_v33, %v1463_v32 }
 0x20d   : > { %v2697_v42 = vpop.f32.mrf.mxu1 }
 0x20e   : > { %v1548_v50 = vadd.f32 %v1546_v36, %v1542_v41 }
 0x20f   : > { %v1626_v24 = vpop.f32.mrf.mxu0 }
 0x210   : > { %1549 = vst [vmem:[%s3654_s5] sm:$0xf] %v1548_v50  ;;  %v1699_v37 = vpop.f32.mrf.mxu1 }
 0x211   : > { %v2702_v56 = vpop.f32.mrf.mxu0  ;;  %v1700_v30 = vadd.f32 %v1699_v37, %v1626_v24 }
 0x212   : > { %v2707_v57 = vpop.f32.mrf.mxu1 }
 0x213   : > { %v1774_v59 = vpop.f32.mrf.mxu0 }
 0x214   : > { %v1778_v47 = vadd.f32 %v1774_v59, %v1700_v30  ;;  %v1853_v45 = vpop.f32.mrf.mxu1 }
 0x215   : > { %v2712_v60 = vpop.f32.mrf.mxu0 }
 0x216   : > { %v1857_v5 = vadd.f32 %v1853_v45, %v1778_v47  ;;  %v2717_v61 = vpop.f32.mrf.mxu1 }
 0x217   : > { %v1934_v63 = vpop.f32.mrf.mxu0 }
 0x218   : > { %v1858_v1 = vadd.f32 %v1857_v5, %v1546_v36  ;;  %v2007_v2 = vpop.f32.mrf.mxu1 }
 0x219   : > { %v2722_v3 = vpop.f32.mrf.mxu0  ;;  %v2008_v28 = vadd.f32 %v2007_v2, %v1934_v63 }
 0x21a   : > { %2613 = vst [vmem:[%s3654_s5 + $0x4] sm:$0xf] %v1858_v1  ;;  %v2727_v8 = vpop.f32.mrf.mxu1 }
 0x223   : > { %v2085_v35 = vpop.f32.mrf.mxu0 }
 0x224   : > { %v2089_v11 = vadd.f32 %v2085_v35, %v2008_v28 }
 0x225   : > { %v2732_v29 = vpop.f32.mrf.mxu0 }
 0x227   : > { %v2245_v39 = vpop.f32.mrf.mxu0 }
 0x229   : > { %v2742_v13 = vpop.f32.mrf.mxu0 }
 0x22b   : > { %v2164_v6 = vpop.f32.mrf.mxu1 }
 0x22c   : > { %v2168_v7 = vadd.f32 %v2164_v6, %v2089_v11 }
 0x22d   : > { %v2737_v40 = vpop.f32.mrf.mxu1  ;;  %v2393_v51 = vpop.f32.mrf.mxu0 }
 0x22e   : > { %v2169_v15 = vadd.f32 %v2168_v7, %v1546_v36 }
 0x22f   : > { %v2318_v62 = vpop.f32.mrf.mxu1  ;;  %v2752_v44 = vpop.f32.mrf.mxu0 }
 0x230   : > { %2626 = vst [vmem:[%s3654_s5 + $0x8] sm:$0xf] %v2169_v15  ;;  %v2319_v52 = vadd.f32 %v2318_v62, %v2245_v39 }
 0x231   : > { %v2747_v34 = vpop.f32.mrf.mxu1 }
 0x232   : > { %v2397_v16 = vadd.f32 %v2393_v51, %v2319_v52 }
 0x238   : > { %v2472_v43 = vpop.f32.mrf.mxu1 }
 0x239   : > { %v2476_v26 = vadd.f32 %v2472_v43, %v2397_v16 }
 0x23a   : > { %v2757_v38 = vpop.f32.mrf.mxu1 }
 0x23b   : > { %v2477_v46 = vadd.f32 %v2476_v26, %v1546_v36 }
 0x23d   : > { %2639 = vst [vmem:[%s3654_s5 + $0xc] sm:$0xf] %v2477_v46 }
 0x23e   : > { %2859 = shalt.err (!%p2856_p7)
}
 0x23f   : > { %s2860_s29 = scalar_lea.hbm %s3667_s15, 256  ;;  %s2864_s7 = scalar_lea.hbm %s3728_s3, 1024 }
 0x240   : > { %p2861_p9 = scmp.ne.s32.totalorder %s3667_s15, %s2860_s29  ;;  %p2865_p12 = scmp.lt.s32.totalorder %s3667_s15, %s3728_s3 }
 0x241   : > { %p2866_p13 = scmp.lt.s32.totalorder %s2864_s7, %s2860_s29 }
 0x242   : > { %p2862_p10 = pnand %p2861_p9, %p3027_p3 }
 0x243   : > { %p2867_p0 = por %p2866_p13, %p2865_p12 }
 0x244   : > { %p2863_p11 = pneg %p2862_p10 }
 0x246   : > { %p2868_p1 = pnand %p2867_p0, %p2863_p11 }
 0x248   : > { %2871 = shalt.err (!%p2868_p1)
}
 0x249   : > { %s2955_s11 = smov 4  }
 0x24a   : > { %2758 = dma.vmem_to_hbm [thread:$0]  (%p3027_p3), %s3662_s9, 256, %s3667_s15, %s3672_s16, %s2946_s28, %s2946_s28, %s2955_s11  }
 0x24b PF: > { %p2764_p2 = scmp.ge.s32.totalorder %s2938_s19, 2  ;;  %s2511_s20 = sand.u32 1, %s2910_s12  }
 0x24c   : > { %s2512_s21 = scalar_lea.sflag [#allocation3], %s2511_s20 }
 0x24d   : > { %p2761_p4 = pnand %p2764_p2, %p3036_p8 }
 0x24f   : > { %p2762_p5 = pneg %p2761_p4 }
 0x251   : > { %2905 = dma.done.wait (%p2762_p5), %s2512_s21, 256  }
 0x252   : > { %2907 = vsyncadd (%p2762_p5), %s2512_s21, 4294967040  ;;  %s16_s19 = sadd.s32 1, %s2938_s19   ;;  %s3731_s12 = smov %s2914_s13 }
 0x253   : > { %p13_p6 = scmp.ge.s32.totalorder %s16_s19, 6   ;;  %s3732_s13 = smov %s2918_s14 }
 0x254   : > { %s3733_s14 = smov %s3045_s30  ;;  %s3734_s15 = smov %s2930_s17 }
 0x255   : > { %s3735_s16 = smov %s2934_s18  ;;  %s3736_s17 = smov %s3739_s22 }
 0x256   : > { %s3737_s18 = smov %s3743_s23  ;;  %15 = sbr.rel (!%p13_p6) target bundleno = 5 (0x5), region = 85 }
 0x25b   :  { %2517 = vsyncpa [#allocation3], 1 }
 0x25c   :  { %2519 = vsyncpa [#allocation3 + $0x1], 1 }

</bundles_post_ra>
